<compile_context>
chip_gen: v7x
topology: tpu7x:2x2x1
jax: 0.10.0
libtpu: 0.0.40
codegen_flags: <defaults>
</compile_context>

<pallas_src>
import jax
import jax.numpy as jnp
from jax.experimental import pallas as pl
from jax.experimental.pallas import tpu as pltpu


def _state_reducer_kernel(h_ref, c_ref, w_ref, b_ref, oh_ref, oc_ref):
    """One grid step = one output-column tile, full K (=2H) contraction.

    h_ref, c_ref : (2, B, H)  direction-major bi-LSTM final states (full block)
    w_ref        : (2, H, tn) reduce_h weight, split by direction along axis 0
    b_ref        : (1, tn)    reduce_h bias tile
    oh_ref/oc_ref: (B, tn)    output tiles
    """
    w0 = w_ref[0]                      # weight rows for direction 0   (H, tn)
    w1 = w_ref[1]                      # weight rows for direction 1   (H, tn)
    b = b_ref[...].astype(jnp.float32)  # (1, tn), broadcasts over rows

    # old_h @ W == h[0] @ W[:H] + h[1] @ W[H:]  -- no concat needed.
    yh = (jnp.dot(h_ref[0], w0, preferred_element_type=jnp.float32)
          + jnp.dot(h_ref[1], w1, preferred_element_type=jnp.float32) + b)
    # Same reduce_h weights for c (faithful to the PyTorch forward).
    yc = (jnp.dot(c_ref[0], w0, preferred_element_type=jnp.float32)
          + jnp.dot(c_ref[1], w1, preferred_element_type=jnp.float32) + b)

    oh_ref[...] = jnp.maximum(yh, 0.0).astype(oh_ref.dtype)
    oc_ref[...] = jnp.maximum(yc, 0.0).astype(oc_ref.dtype)


def state_reducer(state_h_t, state_c_t, w_reduce_h, b_reduce_h):
    """state_h_t, state_c_t: [2, B, H]; w_reduce_h: [2H, H]; b_reduce_h: [H].

    Returns (new_h [B, H], new_c [B, H]).  Both use the reduce_h weights, as in
    the original PyTorch forward (reduce_c_layer is unused there).
    """
    two, B, H = state_h_t.shape
    assert two == 2
    K, N = w_reduce_h.shape
    assert K == 2 * H and N == H and b_reduce_h.shape == (H,)

    # Free (contiguous, row-major) metadata reshapes - no extra HBM pass.
    # w3[d] == w_reduce_h[d*H:(d+1)*H]  (weight rows for direction d).
    w3 = w_reduce_h.reshape(2, H, H)
    b2 = b_reduce_h.reshape(1, H)

    # Output-column tile.  Lane-dense (multiple of 128) when H allows it, and
    # >= 2 tiles when possible so v7x can use both TensorCores.  Otherwise a
    # single full-width block (full-dim blocks are exempt from the (8,128)
    # divisibility rule), which also avoids any padding.
    if H % 256 == 0 and H >= 512:
        tn = 256
    elif H % 128 == 0:
        tn = 128
    else:
        tn = H
    grid = (H // tn,)

    out_dtype = state_h_t.dtype
    itm = state_h_t.dtype.itemsize
    itw = w_reduce_h.dtype.itemsize
    itb = b_reduce_h.dtype.itemsize
    ito = jnp.dtype(out_dtype).itemsize

    # Advisory cost hint for XLA's scheduler around this tiny custom call.
    flops = 2 * 2 * B * (2 * H) * H          # two GEMMs: [B,2H]@[2H,H] each
    bytes_accessed = (w_reduce_h.size * itw + b_reduce_h.size * itb
                      + state_h_t.size * itm + state_c_t.size * itm
                      + 2 * B * H * ito)
    cost = pl.CostEstimate(flops=flops, transcendentals=0,
                           bytes_accessed=bytes_accessed)

    # VMEM budget (double-buffered tiles); only raise the scoped limit when the
    # full-K weight tile actually needs it, and stay inside v7x's 64 MiB VMEM.
    vmem_est = (2 * (2 * H * tn * itw)          # weight column tile
                + 2 * (tn * itb)                # bias tile
                + 2 * 2 * (2 * B * H * itm)     # h and c full blocks
                + 2 * 2 * (B * tn * ito))       # two output tiles
    compiler_kwargs = {"dimension_semantics": ("parallel",)}
    if vmem_est > 24 * 1024 * 1024:
        compiler_kwargs["vmem_limit_bytes"] = min(
            int(vmem_est * 5 // 4), 60 * 1024 * 1024)
    # Assumes the full-K (2H) weight column tile fits VMEM (true for typical
    # hidden sizes); re-introduce a K grid axis + accumulator only for huge H.

    new_h, new_c = pl.pallas_call(
        _state_reducer_kernel,
        out_shape=(jax.ShapeDtypeStruct((B, H), out_dtype),
                   jax.ShapeDtypeStruct((B, H), out_dtype)),
        grid_spec=pltpu.PrefetchScalarGridSpec(
            num_scalar_prefetch=0,
            grid=grid,
            in_specs=[
                pl.BlockSpec((2, B, H), lambda j: (0, 0, 0)),   # state_h_t
                pl.BlockSpec((2, B, H), lambda j: (0, 0, 0)),   # state_c_t
                pl.BlockSpec((2, H, tn), lambda j: (0, 0, j)),  # weight cols
                pl.BlockSpec((1, tn), lambda j: (0, j)),        # bias cols
            ],
            out_specs=[
                pl.BlockSpec((B, tn), lambda j: (0, j)),        # new_h tile
                pl.BlockSpec((B, tn), lambda j: (0, j)),        # new_c tile
            ],
        ),
        compiler_params=pltpu.CompilerParams(**compiler_kwargs),
        cost_estimate=cost,
    )(state_h_t, state_c_t, w3, b2)

    return new_h, new_c


def _reference(state_h_t, state_c_t, w, b):
    # Pure-JAX mirror of the PyTorch forward, for verification.
    old_h = jnp.concatenate([state_h_t[0], state_h_t[1]], axis=-1)
    old_c = jnp.concatenate([state_c_t[0], state_c_t[1]], axis=-1)
    new_h = jax.nn.relu(old_h @ w + b)
    new_c = jax.nn.relu(old_c @ w + b)      # same (reduce_h) weights, per spec
    return new_h, new_c


if __name__ == "__main__":
    B, H = 2, 32   # batch, hidden_size

    key = jax.random.PRNGKey(0)
    k1, k2, k3, k4 = jax.random.split(key, 4)

    state_h_t = jax.random.normal(k1, (2, B, H), dtype=jnp.float32)
    state_c_t = jax.random.normal(k2, (2, B, H), dtype=jnp.float32)
    # reduce_h_layer: Linear(2H -> H) stored as [2H, H] weight + [H] bias
    w_reduce_h = jax.random.normal(k3, (2 * H, H), dtype=jnp.float32) * 0.1
    b_reduce_h = jax.random.normal(k4, (H,), dtype=jnp.float32) * 0.1

    fwd = jax.jit(state_reducer)
    new_h, new_c = fwd(state_h_t, state_c_t, w_reduce_h, b_reduce_h)
    jax.block_until_ready((new_h, new_c))

    ref_h, ref_c = _reference(state_h_t, state_c_t, w_reduce_h, b_reduce_h)
    assert jnp.allclose(new_h, ref_h, rtol=1e-5, atol=1e-5)
    assert jnp.allclose(new_c, ref_c, rtol=1e-5, atol=1e-5)
    print("KERNEL_OK")
</pallas_src>

<mosaic_0001>
module attributes {stable_mosaic.version = 11 : i64} {
  func.func @_state_reducer_kernel(%arg0: i32, %arg1: memref<2x2x32xf32, #tpu.memory_space<vmem>>, %arg2: memref<2x2x32xf32, #tpu.memory_space<vmem>>, %arg3: memref<2x32x32xf32, #tpu.memory_space<vmem>>, %arg4: memref<1x32xf32, #tpu.memory_space<vmem>>, %arg5: memref<2x32xf32, #tpu.memory_space<vmem>>, %arg6: memref<2x32xf32, #tpu.memory_space<vmem>>) attributes {dimension_semantics = [#tpu.dimension_semantics<parallel>], iteration_bounds = array<i64: 1>, scalar_prefetch = 0 : i64, scratch_operands = 0 : i64, tpu.core_type = #tpu.core_type<tc>, window_params = [{pipeline_mode = #tpu.pipeline_mode<synchronous>, transform_indices = @transform_0, window_bounds = array<i64: 2, 2, 32>}, {pipeline_mode = #tpu.pipeline_mode<synchronous>, transform_indices = @transform_1, window_bounds = array<i64: 2, 2, 32>}, {transform_indices = @transform_2, window_bounds = array<i64: 2, 32, 32>}, {transform_indices = @transform_3, window_bounds = array<i64: 1, 32>}, {transform_indices = @transform_4, window_bounds = array<i64: 2, 32>}, {transform_indices = @transform_5, window_bounds = array<i64: 2, 32>}]} {
    %c0 = arith.constant 0 : index
    %c0_0 = arith.constant 0 : index
    %c0_1 = arith.constant 0 : index
    %0 = vector.load %arg3[%c0, %c0_0, %c0_1] : memref<2x32x32xf32, #tpu.memory_space<vmem>>, vector<1x32x32xf32>
    %1 = vector.shape_cast %0 : vector<1x32x32xf32> to vector<32x32xf32>
    %c1 = arith.constant 1 : index
    %c0_2 = arith.constant 0 : index
    %c0_3 = arith.constant 0 : index
    %2 = vector.load %arg3[%c1, %c0_2, %c0_3] : memref<2x32x32xf32, #tpu.memory_space<vmem>>, vector<1x32x32xf32>
    %3 = vector.shape_cast %2 : vector<1x32x32xf32> to vector<32x32xf32>
    %c0_4 = arith.constant 0 : index
    %c0_5 = arith.constant 0 : index
    %4 = vector.load %arg4[%c0_4, %c0_5] : memref<1x32xf32, #tpu.memory_space<vmem>>, vector<1x32xf32>
    %c0_6 = arith.constant 0 : index
    %c0_7 = arith.constant 0 : index
    %c0_8 = arith.constant 0 : index
    %5 = vector.load %arg1[%c0_6, %c0_7, %c0_8] : memref<2x2x32xf32, #tpu.memory_space<vmem>>, vector<1x2x32xf32>
    %6 = vector.shape_cast %5 : vector<1x2x32xf32> to vector<2x32xf32>
    %cst = arith.constant dense<0.000000e+00> : vector<2x32xf32>
    %7 = tpu.matmul %6, %1, %cst {dimension_numbers = #tpu.dot_dimension_numbers<[1], [0], [0], [1], [0, 0, 1, 1], [], []>} : vector<2x32xf32>, vector<32x32xf32>, vector<2x32xf32> -> vector<2x32xf32>
    %c1_9 = arith.constant 1 : index
    %c0_10 = arith.constant 0 : index
    %c0_11 = arith.constant 0 : index
    %8 = vector.load %arg1[%c1_9, %c0_10, %c0_11] : memref<2x2x32xf32, #tpu.memory_space<vmem>>, vector<1x2x32xf32>
    %9 = vector.shape_cast %8 : vector<1x2x32xf32> to vector<2x32xf32>
    %cst_12 = arith.constant dense<0.000000e+00> : vector<2x32xf32>
    %10 = tpu.matmul %9, %3, %cst_12 {dimension_numbers = #tpu.dot_dimension_numbers<[1], [0], [0], [1], [0, 0, 1, 1], [], []>} : vector<2x32xf32>, vector<32x32xf32>, vector<2x32xf32> -> vector<2x32xf32>
    %11 = arith.addf %7, %10 : vector<2x32xf32>
    %12 = vector.broadcast %4 : vector<1x32xf32> to vector<2x32xf32>
    %13 = arith.addf %11, %12 : vector<2x32xf32>
    %c0_13 = arith.constant 0 : index
    %c0_14 = arith.constant 0 : index
    %c0_15 = arith.constant 0 : index
    %14 = vector.load %arg2[%c0_13, %c0_14, %c0_15] : memref<2x2x32xf32, #tpu.memory_space<vmem>>, vector<1x2x32xf32>
    %15 = vector.shape_cast %14 : vector<1x2x32xf32> to vector<2x32xf32>
    %cst_16 = arith.constant dense<0.000000e+00> : vector<2x32xf32>
    %16 = tpu.matmul %15, %1, %cst_16 {dimension_numbers = #tpu.dot_dimension_numbers<[1], [0], [0], [1], [0, 0, 1, 1], [], []>} : vector<2x32xf32>, vector<32x32xf32>, vector<2x32xf32> -> vector<2x32xf32>
    %c1_17 = arith.constant 1 : index
    %c0_18 = arith.constant 0 : index
    %c0_19 = arith.constant 0 : index
    %17 = vector.load %arg2[%c1_17, %c0_18, %c0_19] : memref<2x2x32xf32, #tpu.memory_space<vmem>>, vector<1x2x32xf32>
    %18 = vector.shape_cast %17 : vector<1x2x32xf32> to vector<2x32xf32>
    %cst_20 = arith.constant dense<0.000000e+00> : vector<2x32xf32>
    %19 = tpu.matmul %18, %3, %cst_20 {dimension_numbers = #tpu.dot_dimension_numbers<[1], [0], [0], [1], [0, 0, 1, 1], [], []>} : vector<2x32xf32>, vector<32x32xf32>, vector<2x32xf32> -> vector<2x32xf32>
    %20 = arith.addf %16, %19 : vector<2x32xf32>
    %21 = vector.broadcast %4 : vector<1x32xf32> to vector<2x32xf32>
    %22 = arith.addf %20, %21 : vector<2x32xf32>
    %cst_21 = arith.constant 0.000000e+00 : f32
    %23 = vector.broadcast %cst_21 : f32 to vector<2x32xf32>
    %24 = arith.maximumf %13, %23 : vector<2x32xf32>
    %c0_22 = arith.constant 0 : index
    %c0_23 = arith.constant 0 : index
    %25 = vector.load %arg5[%c0_22, %c0_23] : memref<2x32xf32, #tpu.memory_space<vmem>>, vector<2x32xf32>
    tpu.vector_store %arg5[%c0_22, %c0_23], %24 {strides = array<i32>} : memref<2x32xf32, #tpu.memory_space<vmem>>, vector<2x32xf32>,
    %cst_24 = arith.constant 0.000000e+00 : f32
    %26 = vector.broadcast %cst_24 : f32 to vector<2x32xf32>
    %27 = arith.maximumf %22, %26 : vector<2x32xf32>
    %c0_25 = arith.constant 0 : index
    %c0_26 = arith.constant 0 : index
    %28 = vector.load %arg6[%c0_25, %c0_26] : memref<2x32xf32, #tpu.memory_space<vmem>>, vector<2x32xf32>
    tpu.vector_store %arg6[%c0_25, %c0_26], %27 {strides = array<i32>} : memref<2x32xf32, #tpu.memory_space<vmem>>, vector<2x32xf32>,
    return
  }
  func.func @transform_0(%arg0: i32) -> (i32, i32, i32) {
    %c0_i32 = arith.constant 0 : i32
    %c0_i32_0 = arith.constant 0 : i32
    %c0_i32_1 = arith.constant 0 : i32
    %c0_i32_2 = arith.constant 0 : i32
    return %c0_i32, %c0_i32_0, %c0_i32_1 : i32, i32, i32
  }
  func.func @transform_1(%arg0: i32) -> (i32, i32, i32) {
    %c0_i32 = arith.constant 0 : i32
    %c0_i32_0 = arith.constant 0 : i32
    %c0_i32_1 = arith.constant 0 : i32
    %c0_i32_2 = arith.constant 0 : i32
    return %c0_i32, %c0_i32_0, %c0_i32_1 : i32, i32, i32
  }
  func.func @transform_2(%arg0: i32) -> (i32, i32, i32) {
    %c0_i32 = arith.constant 0 : i32
    %c0_i32_0 = arith.constant 0 : i32
    %c0_i32_1 = arith.constant 0 : i32
    return %c0_i32, %c0_i32_0, %arg0 : i32, i32, i32
  }
  func.func @transform_3(%arg0: i32) -> (i32, i32) {
    %c0_i32 = arith.constant 0 : i32
    %c0_i32_0 = arith.constant 0 : i32
    return %c0_i32, %arg0 : i32, i32
  }
  func.func @transform_4(%arg0: i32) -> (i32, i32) {
    %c0_i32 = arith.constant 0 : i32
    %c0_i32_0 = arith.constant 0 : i32
    return %c0_i32, %arg0 : i32, i32
  }
  func.func @transform_5(%arg0: i32) -> (i32, i32) {
    %c0_i32 = arith.constant 0 : i32
    %c0_i32_0 = arith.constant 0 : i32
    return %c0_i32, %arg0 : i32, i32
  }
}

</mosaic_0001>

<bundles_post_ra>
// kernel: state_reducer.1
= control target key start
LH: loop header
LB: loop body
LE: loop exit
PB: predicated region body
PF: predicated region fallthrough
CT: control target
= control target key end

     0   :  { %11 = vsyncpa [#allocation3], 0  ;;  %v523_v3 = vmov 0.0|0.0   ;;  %vm524_vm0 = vmmov 0   ;;  %v525_v11 = vmov 0.0   ;;  %s631_s0 = inlined_call_operand.vmem [shape: f32[2,2,32], index: 0, kind: input, shape index: {}]   ;;  %s632_s1 = inlined_call_operand.vmem [shape: f32[2,2,32], index: 1, kind: input, shape index: {}]   ;;  %s633_s2 = inlined_call_operand.vmem [shape: f32[2,32,32], index: 2, kind: input, shape index: {}]   ;;  %s634_s3 = inlined_call_operand.vmem [shape: f32[1,32], index: 3, kind: input, shape index: {}]   ;;  %s635_s4 = inlined_call_operand.hbm [shape: f32[2,32], index: 4, kind: output, shape index: {0}]   ;;  %s636_s5 = inlined_call_operand.hbm [shape: f32[2,32], index: 5, kind: output, shape index: {1}]  }
   0x1   :  { %v371_v0 = vld [vmem:[%s633_s2 + $0x20] sm:$0xff]  ;;  %v372_v1 = vld [vmem:[%s633_s2 + $0x28] sm:$0xff]  ;;  %446 = vmatprep.subr.bf16.mxu0 %v523_v3  ;;  %452 = vmatprep.subr.bf16.mxu1 %v523_v3  ;;  %v373_v6 = vld [vmem:[%s633_s2 + $0x30] sm:$0xff] }
   0x2   :  { %v21_v2 = vld [vmem:[%s633_s2] sm:$0xff]  ;;  %v447_v4 = vpack.c.bf16 %v372_v1, %v371_v0  ;;  %v22_v5 = vld [vmem:[%s633_s2 + $0x8] sm:$0xff]  ;;  %v374_v7 = vld [vmem:[%s633_s2 + $0x38] sm:$0xff]  ;;  %410 = vmatprep.mubr.msk.f32.mxu0 %vm524_vm0, %v525_v11  ;;  %421 = vmatprep.mubr.msk.f32.mxu1 %vm524_vm0, %v525_v11 }
   0x3   :  { %v453_v8 = vpack.c.bf16 %v22_v5, %v21_v2  ;;  %v23_v9 = vld [vmem:[%s633_s2 + $0x10] sm:$0xff]  ;;  %v24_v10 = vld [vmem:[%s633_s2 + $0x18] sm:$0xff]  ;;  %v450_v12 = vpack.c.bf16 %v374_v7, %v373_v6 }
   0x4   :  { %448 = vmatpush3.bf16.msra.mxu0 %v447_v4  ;;  %v456_v13 = vpack.c.bf16 %v24_v10, %v23_v9 }
   0x5   :  { %454 = vmatpush3.bf16.msra.mxu1 %v453_v8  ;;  %449 = vmatprep.subr.bf16.mxu0 %v523_v3 }
   0x6   :  { %12 = vsyncpa [#allocation5], 0  ;;  %455 = vmatprep.subr.bf16.mxu1 %v523_v3  ;;  %v375_v14 = vld [vmem:[%s631_s0 + $0x2] sm:$0x3]  ;;  %vm34_vm1 = vcmask 261120   ;;  %s526_s17 = smov [#allocation2]  }
   0x7   :  { %v31_v15 = vld [vmem:[%s631_s0] sm:$0x3]  ;;  %v379_v16 = vld [vmem:[%s632_s1 + $0x2] sm:$0x3]  ;;  %s349_s18 = sshll.u32 %s526_s17, 4  ;;  %vm339_vm2 = vcmask 254976   ;;  %s350_s18 = int_to_ptr.vmem [resolvable:$true] %s349_s18 }
   0x8   :  { %451 = vmatpush3.bf16.msra.mxu0 %v450_v12  ;;  %v188_v17 = vld [vmem:[%s632_s1] sm:$0x3]  ;;  %s475_s1 = scalar_lea.vmem %s350_s18, 32  ;;  %p480_p1 = scmp.lt.s32.totalorder %s350_s18, %s350_s18 }
   0x9   :  { %457 = vmatpush3.bf16.msra.mxu1 %v456_v13  ;;  %458 = vmatprep.subr.bf16.mxu0 %v523_v3  ;;  %v378_v19 = vld [vmem:[%s634_s3] ss:$0 sm:$0xff]  ;;  %p476_p0 = scmp.ne.s32.totalorder %s350_s18, %s475_s1  ;;  %p481_p2 = scmp.lt.s32.totalorder %s475_s1, %s475_s1 }
   0xa   :  { %464 = vmatprep.subr.bf16.mxu1 %v523_v3 }
   0xb   :  { %411 = vmatmul.mubr.msk.f32.vlgmr.msra.gmra.mrb[0].mxu0 %vm34_vm1, %v375_v14  ;;  %p482_p3 = por %p481_p2, %p480_p1 }
   0xc   :  { %422 = vmatmul.mubr.msk.f32.vlgmr.msra.gmra.mrb[0].mxu1 %vm34_vm1, %v31_v15  ;;  %460 = vmatpush3.bf16.msra.mxu0 %v447_v4 }
   0xd   :  { %466 = vmatpush3.bf16.msra.mxu1 %v453_v8  ;;  %461 = vmatprep.subr.bf16.mxu0 %v523_v3  ;;  %p483_p4 = pnand %p482_p3, %p476_p0 }
   0xe   :  { %467 = vmatprep.subr.bf16.mxu1 %v523_v3  ;;  %432 = vmatprep.mubr.msk.f32.mxu0 %vm524_vm0, %v525_v11 }
   0xf   :  { %443 = vmatprep.mubr.msk.f32.mxu1 %vm524_vm0, %v525_v11 }
  0x10   :  { %463 = vmatpush3.bf16.msra.mxu0 %v450_v12 }
  0x11   :  { %469 = vmatpush3.bf16.msra.mxu1 %v456_v13 }
  0x13   :  { %433 = vmatmul.mubr.msk.f32.vlgmr.msra.gmra.mrb[2].mxu0 %vm34_vm1, %v379_v16 }
  0x14   :  { %444 = vmatmul.mubr.msk.f32.vlgmr.msra.gmra.mrb[2].mxu1 %vm34_vm1, %v188_v17 }
  0xde   :  { %v104_v18 = vpop.f32.mrb[0].mxu0 }
  0xdf   :  { %v177_v20 = vpop.f32.mrb[0].mxu1  ;;  %v412_v21 = vpop.f32.mrb[1].mxu0 }
  0xe0   :  { %v178_v22 = vadd.f32 %v177_v20, %v104_v18  ;;  %v423_v23 = vpop.f32.mrb[1].mxu1 }
  0xe2   :  { %v187_v24 = vadd.f32 %v378_v19, %v178_v22 }
  0xe4   :  { %v338_v25 = vmax.f32 %v187_v24, 0.0 }
  0xe6   :  { %v260_v26 = vpop.f32.mrb[2].mxu0  ;;  %340 = vst.msk [vmem:[#allocation2] sm:$0x3] %vm339_vm2, %v338_v25 }
  0xe7   :  { %v333_v27 = vpop.f32.mrb[2].mxu1  ;;  %v434_v28 = vpop.f32.mrb[3].mxu0 }
  0xe8   :  { %486 = shalt.err (!%p483_p4)
}
  0xe9   :  { %s487_s20 = scalar_lea.hbm %s635_s4, 32 }
  0xea   :  { %p488_p5 = scmp.ne.s32.totalorder %s635_s4, %s487_s20  ;;  %p491_p6 = scmp.lt.u32.totalorder %s487_s20, %s635_s4 }
  0xec   :  { %p493_p7 = pnand %p491_p6, %p488_p5 }
  0xee   :  { %496 = shalt.err (!%p493_p7)
}
  0xef   :  { %352 = dma.vmem_to_hbm [thread:$0]  %s350_s18, 32, %s635_s4, [#allocation3]   ;;  %v334_v29 = vadd.f32 %v333_v27, %v260_v26  ;;  %v445_v30 = vpop.f32.mrb[3].mxu1 }
  0xf0   :  { %s527_s27 = smov [#allocation4]  }
  0xf1   :  { %s359_s28 = sshll.u32 %s527_s27, 4  ;;  %v337_v31 = vadd.f32 %v378_v19, %v334_v29  ;;  %s360_s28 = int_to_ptr.vmem [resolvable:$true] %s359_s28 }
  0xf2   :  { %s497_s29 = scalar_lea.vmem %s360_s28, 32  ;;  %p502_p9 = scmp.lt.s32.totalorder %s360_s28, %s360_s28 }
  0xf3   :  { %v341_v32 = vmax.f32 %v337_v31, 0.0  ;;  %p498_p8 = scmp.ne.s32.totalorder %s360_s28, %s497_s29  ;;  %p503_p10 = scmp.lt.s32.totalorder %s497_s29, %s497_s29 }
  0xf5   :  { %342 = vst.msk [vmem:[#allocation4] sm:$0x3] %vm339_vm2, %v341_v32  ;;  %p504_p11 = por %p503_p10, %p502_p9 }
  0xf7   :  { %p505_p12 = pnand %p504_p11, %p498_p8 }
  0xf9   :  { %508 = shalt.err (!%p505_p12)
}
  0xfa   :  { %s509_s4 = scalar_lea.hbm %s636_s5, 32 }
  0xfb   :  { %p510_p13 = scmp.ne.s32.totalorder %s636_s5, %s509_s4  ;;  %p513_p0 = scmp.lt.u32.totalorder %s509_s4, %s636_s5 }
  0xfd   :  { %p515_p1 = pnand %p513_p0, %p510_p13 }
  0xff   :  { %518 = shalt.err (!%p515_p1)
}
 0x100   :  { %362 = dma.vmem_to_hbm [thread:$0]  %s360_s28, 32, %s636_s5, [#allocation5]  }
 0x101   :  { %519 = dma.done.wait [#allocation3], 32  }
 0x102   :  { %520 = vsyncadd [#allocation3], 4294967264 }
 0x103   :  { %521 = dma.done.wait [#allocation5], 32  }
 0x104   :  { %522 = vsyncadd [#allocation5], 4294967264 }
 0x105   :  { %369 = vsyncpa [#allocation3], 1 }
 0x106   :  { %370 = vsyncpa [#allocation5], 1 }

</bundles_post_ra>
